<compile_context>
chip_gen: v7x
topology: tpu7x:2x2x1
jax: 0.10.0
libtpu: 0.0.40
codegen_flags: <defaults>
</compile_context>

<pallas_src>
import jax
import jax.numpy as jnp
from jax.experimental import pallas as pl
from jax.experimental.pallas import tpu as pltpu


def _round_up(x, m):
    return ((x + m - 1) // m) * m


def _nbytes(a):
    return int(a.size) * jnp.dtype(a.dtype).itemsize


def _itr_kernel(f1_ref, f2_ref,
                w0a_ref, w0b_ref, b0_ref,
                w1_ref, b1_ref,
                w2_ref, b2_ref,
                out_ref):
    # F.normalize(x, p=2, dim=1): x / max(||x||, eps) == x * rsqrt(max(||x||^2, eps^2))
    eps2 = jnp.float32(1e-24)                 # (torch default eps = 1e-12)^2

    f1 = f1_ref[...].astype(jnp.float32)
    f2 = f2_ref[...].astype(jnp.float32)
    ss1 = jnp.sum(f1 * f1, axis=-1, keepdims=True)
    ss2 = jnp.sum(f2 * f2, axis=-1, keepdims=True)

    mm_dtype = w0a_ref.dtype                  # bf16 operands -> native-rate MXU
    f1n = (f1 * jax.lax.rsqrt(jnp.maximum(ss1, eps2))).astype(mm_dtype)
    f2n = (f2 * jax.lax.rsqrt(jnp.maximum(ss2, eps2))).astype(mm_dtype)

    # Layer 0 + ReLU.  Concat fused as two dots: the normalized halves stay in
    # vregs (no VMEM slab round trip) and there is no D % 128 requirement.
    h = (jnp.dot(f1n, w0a_ref[...], preferred_element_type=jnp.float32)
         + jnp.dot(f2n, w0b_ref[...], preferred_element_type=jnp.float32)
         + b0_ref[...])
    h = jnp.maximum(h, 0.0).astype(w1_ref.dtype)

    # Layer 1 + ReLU.
    h = jnp.dot(h, w1_ref[...], preferred_element_type=jnp.float32) + b1_ref[...]
    h = jnp.maximum(h, 0.0).astype(w2_ref.dtype)

    # Layer 2 (logits, lane-padded to a multiple of 128 -> unmasked stores).
    out = jnp.dot(h, w2_ref[...], preferred_element_type=jnp.float32) + b2_ref[...]
    out_ref[...] = out.astype(out_ref.dtype)


def _pad2(a, rows, cols, dtype=None):
    r, c = a.shape
    if rows != r or cols != c:
        a = jnp.pad(a, ((0, rows - r), (0, cols - c)))
    return a.astype(dtype) if dtype is not None else a


def _batch_tiling(B, batch_tile):
    """Returns (Bp, TB, n_tiles).  Batches >= 16 get an even tile count so both
    v7x TensorCores are used; tiny batches stay gridless."""
    B8 = _round_up(B, 8)
    if B8 < 16:
        return B8, B8, 1
    tile_cap = _round_up(max(batch_tile, 8), 8)
    n = max(2, -(-B8 // tile_cap))
    if n % 2:
        n += 1
    TB = _round_up(-(-B8 // n), 8)
    return n * TB, TB, n


def itr_forward(features1, features2, params, *,
                batch_tile=512, weight_dtype=jnp.bfloat16, out_dtype=jnp.float32):
    """features1/features2: [B, D] backbone features.
    params: pre-transposed linears (w_i: [in, out], b_i: [1, out])."""
    B, D = features1.shape
    w0, b0 = params["w0"], params["b0"]   # [2D, H1], [1, H1]
    w1, b1 = params["w1"], params["b1"]   # [H1, H2], [1, H2]
    w2, b2 = params["w2"], params["b2"]   # [H2, C],  [1, C]
    H1, H2, C = w0.shape[1], w1.shape[1], w2.shape[1]

    # Lane-pad every contraction / output dim to 128.  Zero pads are exact no-ops:
    # zero feature cols x zero weight rows, relu(0)=0 padded hidden cols feeding zero
    # weight rows, padded logit cols sliced off below.
    Dp, H1p, H2p, Cp = (_round_up(x, 128) for x in (D, H1, H2, C))
    Bp, TB, n_tiles = _batch_tiling(B, batch_tile)

    f1p = _pad2(features1, Bp, Dp)
    f2p = _pad2(features2, Bp, Dp)
    w0ap = _pad2(w0[:D], Dp, H1p, weight_dtype)
    w0bp = _pad2(w0[D:], Dp, H1p, weight_dtype)
    b0p = _pad2(b0, 1, H1p, jnp.float32)
    w1p = _pad2(w1, H1p, H2p, weight_dtype)
    b1p = _pad2(b1, 1, H2p, jnp.float32)
    w2p = _pad2(w2, H2p, Cp, weight_dtype)
    b2p = _pad2(b2, 1, Cp, jnp.float32)

    args = (f1p, f2p, w0ap, w0bp, b0p, w1p, b1p, w2p, b2p)
    out_shape = jax.ShapeDtypeStruct((Bp, Cp), out_dtype)

    weight_bytes = sum(_nbytes(a) for a in args[2:])
    out_bytes = Bp * Cp * jnp.dtype(out_dtype).itemsize
    cost = pl.CostEstimate(
        flops=2 * Bp * (2 * Dp * H1p + H1p * H2p + H2p * Cp) + 6 * Bp * Dp,
        transcendentals=2 * Bp,
        bytes_accessed=_nbytes(f1p) + _nbytes(f2p) + weight_bytes + out_bytes)

    if n_tiles == 1:
        # Gridless single invocation: everything VMEM-resident, no pipeline overhead.
        out = pl.pallas_call(
            _itr_kernel,
            out_shape=out_shape,
            in_specs=[pl.BlockSpec(memory_space=pltpu.MemorySpace.VMEM) for _ in args],
            out_specs=pl.BlockSpec(memory_space=pltpu.MemorySpace.VMEM),
            cost_estimate=cost,
        )(*args)
        return out[:B, :C]

    def run_tiled(single_buffer_weights):
        # Weights/biases have a constant block index across the grid -> they are
        # never re-fetched; single-buffer them to halve their VMEM footprint.
        wkw = {"pipeline_mode": pl.Buffered(1)} if single_buffer_weights else {}

        def const_spec(shape):
            return pl.BlockSpec(shape, lambda i: (0,) * len(shape), **wkw)

        wbuf = 1 if single_buffer_weights else 2
        stream_bytes = 2 * (2 * TB * Dp * jnp.dtype(f1p.dtype).itemsize
                            + TB * Cp * jnp.dtype(out_dtype).itemsize)
        vmem_limit = int(2.0 * (weight_bytes * wbuf + stream_bytes)) + (2 << 20)
        vmem_limit = min(max(vmem_limit, 16 << 20), 64 << 20)

        return pl.pallas_call(
            _itr_kernel,
            out_shape=out_shape,
            grid=(n_tiles,),
            in_specs=[
                pl.BlockSpec((TB, Dp), lambda i: (i, 0)),
                pl.BlockSpec((TB, Dp), lambda i: (i, 0)),
                const_spec(w0ap.shape), const_spec(w0bp.shape), const_spec(b0p.shape),
                const_spec(w1p.shape), const_spec(b1p.shape),
                const_spec(w2p.shape), const_spec(b2p.shape),
            ],
            out_specs=pl.BlockSpec((TB, Cp), lambda i: (i, 0)),
            cost_estimate=cost,
            compiler_params=pltpu.CompilerParams(
                dimension_semantics=("parallel",),
                vmem_limit_bytes=vmem_limit),
        )(*args)

    try:
        out = run_tiled(True)
    except Exception:
        # Fallback for jax builds where pipeline_mode=pl.Buffered(1) is not supported
        # on the pallas_call grid pipeline: use default (double) buffering.
        out = run_tiled(False)

    return out[:B, :C]


def init_params(key, in_features, nb_classes, nb_layers):
    """Deterministic synthetic init mirroring the nn.Linear shapes of ITR."""
    sizes = [in_features // (2 ** i) for i in range(nb_layers)] + [nb_classes]
    params = {}
    for i in range(nb_layers):
        key, kw, kb = jax.random.split(key, 3)
        fan_in, fan_out = sizes[i], sizes[i + 1]
        bound = 1.0 / (fan_in ** 0.5)
        # stored pre-transposed as [in, out]
        params[f"w{i}"] = jax.random.uniform(
            kw, (fan_in, fan_out), jnp.float32, -bound, bound)
        params[f"b{i}"] = jax.random.uniform(
            kb, (1, fan_out), jnp.float32, -bound, bound)
    return params, sizes


def _normalize(x, eps=1e-12):
    return x / jnp.maximum(jnp.linalg.norm(x, axis=1, keepdims=True), eps)


def reference_forward(f1, f2, params, mm_dtype=jnp.float32):
    """Pure-JAX reference.  mm_dtype=bf16 mirrors the kernel's MXU operand rounding."""
    x = jnp.concatenate([_normalize(f1), _normalize(f2)], axis=1)
    n_layers = len(params) // 2
    for i in range(n_layers):
        w = params[f"w{i}"].astype(mm_dtype)
        x = jnp.dot(x.astype(mm_dtype), w,
                    preferred_element_type=jnp.float32) + params[f"b{i}"]
        if i + 1 < n_layers:
            x = jax.nn.relu(x)
    return x


if __name__ == "__main__":
    # Small shapes consistent with the module structure:
    # in_features=256 -> layer sizes [256, 128, 64, 2]; each backbone feature is 128-d.
    IN_FEATURES = 256
    NB_CLASSES = 2
    NB_LAYERS = 3
    D = IN_FEATURES // 2

    key = jax.random.PRNGKey(0)
    kp, k1, k2, k3, k4 = jax.random.split(key, 5)
    params, sizes = init_params(kp, IN_FEATURES, NB_CLASSES, NB_LAYERS)

    # --- small batch: gridless path ---
    B = 4
    f1 = jax.random.normal(k1, (B, D), jnp.float32)
    f2 = jax.random.normal(k2, (B, D), jnp.float32)
    out = jax.block_until_ready(itr_forward(f1, f2, params))
    assert out.shape == (B, NB_CLASSES)
    ref_q = reference_forward(f1, f2, params, mm_dtype=jnp.bfloat16)  # same bf16 rounding
    ref_f = reference_forward(f1, f2, params, mm_dtype=jnp.float32)   # true f32 semantics
    assert jnp.allclose(out, ref_q, atol=2e-3, rtol=2e-3), float(jnp.max(jnp.abs(out - ref_q)))
    assert jnp.allclose(out, ref_f, atol=1e-2, rtol=1e-2), float(jnp.max(jnp.abs(out - ref_f)))

    # --- larger batch: tiled grid path (even tile count, resident bf16 weights) ---
    B2 = 40
    g1 = jax.random.normal(k3, (B2, D), jnp.float32)
    g2 = jax.random.normal(k4, (B2, D), jnp.float32)
    out2 = jax.block_until_ready(itr_forward(g1, g2, params, batch_tile=512))
    assert out2.shape == (B2, NB_CLASSES)
    ref2 = reference_forward(g1, g2, params, mm_dtype=jnp.bfloat16)
    assert jnp.allclose(out2, ref2, atol=2e-3, rtol=2e-3), float(jnp.max(jnp.abs(out2 - ref2)))

    print("KERNEL_OK")
</pallas_src>

<mosaic_0001>
module attributes {stable_mosaic.version = 11 : i64} {
  func.func @_itr_kernel(%arg0: memref<8x128xf32, #tpu.memory_space<vmem>>, %arg1: memref<8x128xf32, #tpu.memory_space<vmem>>, %arg2: memref<128x128xbf16, #tpu.memory_space<vmem>>, %arg3: memref<128x128xbf16, #tpu.memory_space<vmem>>, %arg4: memref<1x128xf32, #tpu.memory_space<vmem>>, %arg5: memref<128x128xbf16, #tpu.memory_space<vmem>>, %arg6: memref<1x128xf32, #tpu.memory_space<vmem>>, %arg7: memref<128x128xbf16, #tpu.memory_space<vmem>>, %arg8: memref<1x128xf32, #tpu.memory_space<vmem>>, %arg9: memref<8x128xf32, #tpu.memory_space<vmem>>) attributes {dimension_semantics = [], scalar_prefetch = 0 : i64, scratch_operands = 0 : i64, tpu.core_type = #tpu.core_type<tc>} {
    %c0 = arith.constant 0 : index
    %c0_0 = arith.constant 0 : index
    %0 = vector.load %arg0[%c0, %c0_0] : memref<8x128xf32, #tpu.memory_space<vmem>>, vector<8x128xf32>
    %c0_1 = arith.constant 0 : index
    %c0_2 = arith.constant 0 : index
    %1 = vector.load %arg1[%c0_1, %c0_2] : memref<8x128xf32, #tpu.memory_space<vmem>>, vector<8x128xf32>
    %2 = arith.mulf %0, %0 : vector<8x128xf32>
    %cst = arith.constant dense<0.000000e+00> : vector<8xf32>
    %3 = vector.multi_reduction <add>, %2, %cst [1] : vector<8x128xf32> to vector<8xf32>
    %4 = vector.shape_cast %3 : vector<8xf32> to vector<8x1xf32>
    %5 = arith.mulf %1, %1 : vector<8x128xf32>
    %cst_3 = arith.constant dense<0.000000e+00> : vector<8xf32>
    %6 = vector.multi_reduction <add>, %5, %cst_3 [1] : vector<8x128xf32> to vector<8xf32>
    %7 = vector.shape_cast %6 : vector<8xf32> to vector<8x1xf32>
    %cst_4 = arith.constant 1.000000e-24 : f32
    %8 = vector.broadcast %cst_4 : f32 to vector<8x1xf32>
    %9 = arith.maximumf %4, %8 : vector<8x1xf32>
    %10 = math.rsqrt %9 : vector<8x1xf32>
    %11 = vector.broadcast %10 : vector<8x1xf32> to vector<8x128xf32>
    %12 = arith.mulf %0, %11 : vector<8x128xf32>
    %13 = arith.truncf %12 : vector<8x128xf32> to vector<8x128xbf16>
    %cst_5 = arith.constant 1.000000e-24 : f32
    %14 = vector.broadcast %cst_5 : f32 to vector<8x1xf32>
    %15 = arith.maximumf %7, %14 : vector<8x1xf32>
    %16 = math.rsqrt %15 : vector<8x1xf32>
    %17 = vector.broadcast %16 : vector<8x1xf32> to vector<8x128xf32>
    %18 = arith.mulf %1, %17 : vector<8x128xf32>
    %19 = arith.truncf %18 : vector<8x128xf32> to vector<8x128xbf16>
    %c0_6 = arith.constant 0 : index
    %c0_7 = arith.constant 0 : index
    %20 = vector.load %arg2[%c0_6, %c0_7] : memref<128x128xbf16, #tpu.memory_space<vmem>>, vector<128x128xbf16>
    %cst_8 = arith.constant dense<0.000000e+00> : vector<8x128xf32>
    %21 = tpu.matmul %13, %20, %cst_8 {dimension_numbers = #tpu.dot_dimension_numbers<[1], [0], [0], [1], [0, 0, 1, 1], [], []>} : vector<8x128xbf16>, vector<128x128xbf16>, vector<8x128xf32> -> vector<8x128xf32>
    %c0_9 = arith.constant 0 : index
    %c0_10 = arith.constant 0 : index
    %22 = vector.load %arg3[%c0_9, %c0_10] : memref<128x128xbf16, #tpu.memory_space<vmem>>, vector<128x128xbf16>
    %cst_11 = arith.constant dense<0.000000e+00> : vector<8x128xf32>
    %23 = tpu.matmul %19, %22, %cst_11 {dimension_numbers = #tpu.dot_dimension_numbers<[1], [0], [0], [1], [0, 0, 1, 1], [], []>} : vector<8x128xbf16>, vector<128x128xbf16>, vector<8x128xf32> -> vector<8x128xf32>
    %24 = arith.addf %21, %23 : vector<8x128xf32>
    %c0_12 = arith.constant 0 : index
    %c0_13 = arith.constant 0 : index
    %25 = vector.load %arg4[%c0_12, %c0_13] : memref<1x128xf32, #tpu.memory_space<vmem>>, vector<1x128xf32>
    %26 = vector.broadcast %25 : vector<1x128xf32> to vector<8x128xf32>
    %27 = arith.addf %24, %26 : vector<8x128xf32>
    %cst_14 = arith.constant 0.000000e+00 : f32
    %28 = vector.broadcast %cst_14 : f32 to vector<8x128xf32>
    %29 = arith.maximumf %27, %28 : vector<8x128xf32>
    %30 = arith.truncf %29 : vector<8x128xf32> to vector<8x128xbf16>
    %c0_15 = arith.constant 0 : index
    %c0_16 = arith.constant 0 : index
    %31 = vector.load %arg5[%c0_15, %c0_16] : memref<128x128xbf16, #tpu.memory_space<vmem>>, vector<128x128xbf16>
    %cst_17 = arith.constant dense<0.000000e+00> : vector<8x128xf32>
    %32 = tpu.matmul %30, %31, %cst_17 {dimension_numbers = #tpu.dot_dimension_numbers<[1], [0], [0], [1], [0, 0, 1, 1], [], []>} : vector<8x128xbf16>, vector<128x128xbf16>, vector<8x128xf32> -> vector<8x128xf32>
    %c0_18 = arith.constant 0 : index
    %c0_19 = arith.constant 0 : index
    %33 = vector.load %arg6[%c0_18, %c0_19] : memref<1x128xf32, #tpu.memory_space<vmem>>, vector<1x128xf32>
    %34 = vector.broadcast %33 : vector<1x128xf32> to vector<8x128xf32>
    %35 = arith.addf %32, %34 : vector<8x128xf32>
    %cst_20 = arith.constant 0.000000e+00 : f32
    %36 = vector.broadcast %cst_20 : f32 to vector<8x128xf32>
    %37 = arith.maximumf %35, %36 : vector<8x128xf32>
    %38 = arith.truncf %37 : vector<8x128xf32> to vector<8x128xbf16>
    %c0_21 = arith.constant 0 : index
    %c0_22 = arith.constant 0 : index
    %39 = vector.load %arg7[%c0_21, %c0_22] : memref<128x128xbf16, #tpu.memory_space<vmem>>, vector<128x128xbf16>
    %cst_23 = arith.constant dense<0.000000e+00> : vector<8x128xf32>
    %40 = tpu.matmul %38, %39, %cst_23 {dimension_numbers = #tpu.dot_dimension_numbers<[1], [0], [0], [1], [0, 0, 1, 1], [], []>} : vector<8x128xbf16>, vector<128x128xbf16>, vector<8x128xf32> -> vector<8x128xf32>
    %c0_24 = arith.constant 0 : index
    %c0_25 = arith.constant 0 : index
    %41 = vector.load %arg8[%c0_24, %c0_25] : memref<1x128xf32, #tpu.memory_space<vmem>>, vector<1x128xf32>
    %42 = vector.broadcast %41 : vector<1x128xf32> to vector<8x128xf32>
    %43 = arith.addf %40, %42 : vector<8x128xf32>
    %c0_26 = arith.constant 0 : index
    %c0_27 = arith.constant 0 : index
    %44 = vector.load %arg9[%c0_26, %c0_27] : memref<8x128xf32, #tpu.memory_space<vmem>>, vector<8x128xf32>
    tpu.vector_store %arg9[%c0_26, %c0_27], %43 {strides = array<i32>} : memref<8x128xf32, #tpu.memory_space<vmem>>, vector<8x128xf32>,
    return
  }
}

</mosaic_0001>

<bundles_post_ra>
// kernel: tpu_custom_call.1
= control target key start
LH: loop header
LB: loop body
LE: loop exit
PB: predicated region body
PF: predicated region fallthrough
CT: control target
= control target key end

     0   :  { %14 = vsyncpa [#allocation3], 0  ;;  %s1167_s0 = inlined_call_operand.hbm [shape: f32[8,128], index: 0, kind: input, shape index: {}]   ;;  %s1168_s1 = inlined_call_operand.hbm [shape: f32[8,128], index: 1, kind: input, shape index: {}]   ;;  %s1169_s2 = inlined_call_operand.hbm [shape: bf16[128,128], index: 2, kind: input, shape index: {}]   ;;  %s1170_s3 = inlined_call_operand.hbm [shape: bf16[128,128], index: 3, kind: input, shape index: {}]   ;;  %s1171_s4 = inlined_call_operand.vmem [shape: f32[1,128], index: 4, kind: input, shape index: {}]   ;;  %s1172_s5 = inlined_call_operand.hbm [shape: bf16[128,128], index: 5, kind: input, shape index: {}]   ;;  %s1173_s6 = inlined_call_operand.vmem [shape: f32[1,128], index: 6, kind: input, shape index: {}]   ;;  %s1174_s7 = inlined_call_operand.hbm [shape: bf16[128,128], index: 7, kind: input, shape index: {}]   ;;  %s1175_s8 = inlined_call_operand.vmem [shape: f32[1,128], index: 8, kind: input, shape index: {}]   ;;  %s1176_s9 = inlined_call_operand.hbm [shape: f32[8,128], index: 9, kind: output, shape index: {}]  }
   0x1   :  { %15 = vsyncpa [#allocation6], 0 }
   0x2   :  { %16 = vsyncpa [#allocation9], 0 }
   0x3   :  { %17 = vsyncpa [#allocation12], 0 }
   0x4   :  { %18 = vsyncpa [#allocation4], 0  ;;  %s951_s30 = smov [#allocation5]   ;;  %s787_s13 = scalar_lea.hbm %s1168_s1, 128 }
   0x5   :  { %s35_s10 = sshll.u32 %s951_s30, 4  ;;  %p788_p0 = scmp.ne.s32.totalorder %s1168_s1, %s787_s13  ;;  %s36_s10 = int_to_ptr.vmem [resolvable:$true] %s35_s10 }
   0x6   :  { %p791_p1 = scmp.lt.u32.totalorder %s787_s13, %s1168_s1 }
   0x8   :  { %p793_p2 = pnand %p791_p1, %p788_p0 }
   0xa   :  { %796 = shalt.err (!%p793_p2)
}
   0xb   :  { %s797_s18 = scalar_lea.vmem %s36_s10, 128  ;;  %p802_p4 = scmp.lt.s32.totalorder %s36_s10, %s36_s10 }
   0xc   :  { %p798_p3 = scmp.ne.s32.totalorder %s36_s10, %s797_s18  ;;  %p803_p5 = scmp.lt.s32.totalorder %s797_s18, %s797_s18 }
   0xe   :  { %p804_p6 = por %p803_p5, %p802_p4 }
  0x10   :  { %p805_p7 = pnand %p804_p6, %p798_p3 }
  0x12   :  { %808 = shalt.err (!%p805_p7)
}
  0x13   :  { %38 = dma.hbm_to_vmem [thread:$0]  %s1168_s1, 128, %s36_s10, [#allocation6]  }
  0x14   :  { %s952_s21 = smov [#allocation8]   ;;  %s953_s23 = smov [#allocation2]  }
  0x15   :  { %s56_s22 = sshll.u32 %s952_s21, 4  ;;  %s25_s24 = sshll.u32 %s953_s23, 4  ;;  %s57_s22 = int_to_ptr.vmem [resolvable:$true] %s56_s22  ;;  %s26_s24 = int_to_ptr.vmem [resolvable:$true] %s25_s24 }
  0x16   :  { %s809_s27 = scalar_lea.hbm %s1170_s3, 1024 }
  0x17   :  { %p810_p8 = scmp.ne.s32.totalorder %s1170_s3, %s809_s27  ;;  %p813_p9 = scmp.lt.u32.totalorder %s809_s27, %s1170_s3 }
  0x19   :  { %p815_p10 = pnand %p813_p9, %p810_p8 }
  0x1b   :  { %818 = shalt.err (!%p815_p10)
}
  0x1c   :  { %s819_s1 = scalar_lea.vmem %s57_s22, 1024  ;;  %p824_p12 = scmp.lt.s32.totalorder %s57_s22, %s57_s22 }
  0x1d   :  { %p820_p11 = scmp.ne.s32.totalorder %s57_s22, %s819_s1  ;;  %p825_p13 = scmp.lt.s32.totalorder %s819_s1, %s819_s1 }
  0x1f   :  { %p826_p0 = por %p825_p13, %p824_p12 }
  0x21   :  { %p827_p1 = pnand %p826_p0, %p820_p11 }
  0x23   :  { %830 = shalt.err (!%p827_p1)
}
  0x24   :  { %s954_s10 = smov 64   ;;  %s955_s12 = smov 4  }
  0x25   :  { %62 = dma.hbm_to_vmem [thread:$0]  %s1170_s3, 1024, %s57_s22, [#allocation9], %s954_s10, %s954_s10, %s955_s12  }
  0x26   :  { %s831_s17 = scalar_lea.hbm %s1167_s0, 128 }
  0x27   :  { %p832_p2 = scmp.ne.s32.totalorder %s1167_s0, %s831_s17  ;;  %p835_p3 = scmp.lt.u32.totalorder %s831_s17, %s1167_s0 }
  0x29   :  { %p837_p4 = pnand %p835_p3, %p832_p2 }
  0x2b   :  { %840 = shalt.err (!%p837_p4)
}
  0x2c   :  { %s841_s23 = scalar_lea.vmem %s26_s24, 128  ;;  %p846_p6 = scmp.lt.s32.totalorder %s26_s24, %s26_s24 }
  0x2d   :  { %p842_p5 = scmp.ne.s32.totalorder %s26_s24, %s841_s23  ;;  %p847_p7 = scmp.lt.s32.totalorder %s841_s23, %s841_s23 }
  0x2f   :  { %p848_p8 = por %p847_p7, %p846_p6 }
  0x31   :  { %p849_p9 = pnand %p848_p8, %p842_p5 }
  0x33   :  { %852 = shalt.err (!%p849_p9)
}
  0x34   :  { %28 = dma.hbm_to_vmem [thread:$0]  %s1167_s0, 128, %s26_s24, [#allocation3]  }
  0x35   :  { %s956_s25 = smov [#allocation7]   ;;  %s957_s27 = smov [#allocation10]  }
  0x36   :  { %s44_s26 = sshll.u32 %s956_s25, 4  ;;  %s70_s28 = sshll.u32 %s957_s27, 4  ;;  %s45_s26 = int_to_ptr.vmem [resolvable:$true] %s44_s26  ;;  %s71_s28 = int_to_ptr.vmem [resolvable:$true] %s70_s28 }
  0x37   :  { %s853_s11 = scalar_lea.hbm %s1169_s2, 1024 }
  0x38   :  { %p854_p10 = scmp.ne.s32.totalorder %s1169_s2, %s853_s11  ;;  %p857_p11 = scmp.lt.u32.totalorder %s853_s11, %s1169_s2 }
  0x3a   :  { %p859_p12 = pnand %p857_p11, %p854_p10 }
  0x3c   :  { %862 = shalt.err (!%p859_p12)
}
  0x3d   :  { %s863_s0 = scalar_lea.vmem %s45_s26, 1024  ;;  %p868_p0 = scmp.lt.s32.totalorder %s45_s26, %s45_s26 }
  0x3e   :  { %p864_p13 = scmp.ne.s32.totalorder %s45_s26, %s863_s0  ;;  %p869_p1 = scmp.lt.s32.totalorder %s863_s0, %s863_s0 }
  0x40   :  { %p870_p2 = por %p869_p1, %p868_p0 }
  0x42   :  { %p871_p3 = pnand %p870_p2, %p864_p13 }
  0x44   :  { %874 = shalt.err (!%p871_p3)
}
  0x45   :  { %50 = dma.hbm_to_vmem [thread:$0]  %s1169_s2, 1024, %s45_s26, [#allocation6], %s954_s10, %s954_s10, %s955_s12  }
  0x46   :  { %s875_s19 = scalar_lea.hbm %s1172_s5, 1024 }
  0x47   :  { %p876_p4 = scmp.ne.s32.totalorder %s1172_s5, %s875_s19  ;;  %p879_p5 = scmp.lt.u32.totalorder %s875_s19, %s1172_s5 }
  0x49   :  { %p881_p6 = pnand %p879_p5, %p876_p4 }
  0x4b   :  { %884 = shalt.err (!%p881_p6)
}
  0x4c   :  { %s885_s22 = scalar_lea.vmem %s71_s28, 1024  ;;  %p890_p8 = scmp.lt.s32.totalorder %s71_s28, %s71_s28 }
  0x4d   :  { %p886_p7 = scmp.ne.s32.totalorder %s71_s28, %s885_s22  ;;  %p891_p9 = scmp.lt.s32.totalorder %s885_s22, %s885_s22 }
  0x4f   :  { %p892_p10 = por %p891_p9, %p890_p8 }
  0x51   :  { %p893_p11 = pnand %p892_p10, %p886_p7 }
  0x53   :  { %896 = shalt.err (!%p893_p11)
}
  0x54   :  { %76 = dma.hbm_to_vmem [thread:$0]  %s1172_s5, 1024, %s71_s28, [#allocation9], %s954_s10, %s954_s10, %s955_s12  }
  0x55   :  { %s958_s26 = smov [#allocation11]   ;;  %s897_s11 = scalar_lea.hbm %s1174_s7, 1024 }
  0x56   :  { %s84_s27 = sshll.u32 %s958_s26, 4  ;;  %p898_p12 = scmp.ne.s32.totalorder %s1174_s7, %s897_s11  ;;  %s85_s27 = int_to_ptr.vmem [resolvable:$true] %s84_s27 }
  0x57   :  { %p901_p13 = scmp.lt.u32.totalorder %s897_s11, %s1174_s7 }
  0x59   :  { %p903_p0 = pnand %p901_p13, %p898_p12 }
  0x5b   :  { %906 = shalt.err (!%p903_p0)
}
  0x5c   :  { %s907_s0 = scalar_lea.vmem %s85_s27, 1024  ;;  %p912_p2 = scmp.lt.s32.totalorder %s85_s27, %s85_s27 }
  0x5d   :  { %p908_p1 = scmp.ne.s32.totalorder %s85_s27, %s907_s0  ;;  %p913_p3 = scmp.lt.s32.totalorder %s907_s0, %s907_s0 }
  0x5f   :  { %p914_p4 = por %p913_p3, %p912_p2 }
  0x61   :  { %p915_p5 = pnand %p914_p4, %p908_p1 }
  0x63   :  { %918 = shalt.err (!%p915_p5)
}
  0x64   :  { %90 = dma.hbm_to_vmem [thread:$0]  %s1174_s7, 1024, %s85_s27, [#allocation12], %s954_s10, %s954_s10, %s955_s12  }
  0x65   :  { %941 = dma.done.wait [#allocation3], 128  }
  0x66   :  { %942 = vsyncadd [#allocation3], 4294967168 }
  0x67   :  { %943 = dma.done.wait [#allocation6], 1152  }
  0x68   :  { %944 = vsyncadd [#allocation6], 4294966144 }
  0x69   :  { %945 = dma.done.wait [#allocation9], 2048  }
  0x6a   :  { %946 = vsyncadd [#allocation9], 4294965248 }
  0x6b   :  { %947 = dma.done.wait [#allocation12], 1024  }
  0x6c   :  { %948 = vsyncadd [#allocation12], 4294966272  ;;  %v959_v0 = vmov 0.0   ;;  %v1098_v1 = vld [vmem:[#allocation2] sm:$0xff]  ;;  %v1100_v2 = vld [vmem:[#allocation5] sm:$0xff]  ;;  %vm960_vm0 = vmmov 0  }
  0x6d   :  { %680 = vmatprep.subr.bf16.mxu1 %v959_v0  ;;  %660 = vmatprep.subr.bf16.mxu0 %v959_v0  ;;  %v114_v3 = vmul.f32 %v1098_v1, %v1098_v1  ;;  %v751_v4 = vld [vmem:[#allocation7] sm:$0xff]   ;;  %v117_v6 = vmul.f32 %v1100_v2, %v1100_v2  ;;  %v753_v7 = vld [vmem:[#allocation7 + $0x8] sm:$0xff]   ;;  %v755_v9 = vld [vmem:[#allocation7 + $0x10] sm:$0xff]   ;;  %s961_s17 = smov [#allocation13]  }
  0x6e   :  { %v752_v5 = vld [vmem:[#allocation8] sm:$0xff]   ;;  %681 = vmatpush3.bf16.msra.mxu1 %v751_v4  ;;  %v754_v8 = vld [vmem:[#allocation8 + $0x8] sm:$0xff]   ;;  %v756_v10 = vld [vmem:[#allocation8 + $0x10] sm:$0xff]   ;;  %696 = vmatprep.mubr.msk.bf16.mxu1 %vm960_vm0, %v959_v0  ;;  %s577_s18 = sshll.u32 %s961_s17, 4  ;;  %s578_s18 = int_to_ptr.vmem [resolvable:$true] %s577_s18 }
  0x6f   :  { %115 = vadd.xlane.f32.xlu0 %v114_v3  ;;  %682 = vmatprep.subr.bf16.mxu1 %v959_v0  ;;  %v757_v11 = vld [vmem:[#allocation7 + $0x18] sm:$0xff]   ;;  %v759_v13 = vld [vmem:[#allocation7 + $0x20] sm:$0xff]   ;;  %v761_v15 = vld [vmem:[#allocation7 + $0x28] sm:$0xff]   ;;  %p924_p7 = scmp.lt.s32.totalorder %s578_s18, %s578_s18 }
  0x70   :  { %661 = vmatpush3.bf16.msra.mxu0 %v752_v5  ;;  %v758_v12 = vld [vmem:[#allocation8 + $0x18] sm:$0xff]   ;;  %v760_v14 = vld [vmem:[#allocation8 + $0x20] sm:$0xff]   ;;  %v762_v16 = vld [vmem:[#allocation8 + $0x28] sm:$0xff]   ;;  %676 = vmatprep.mubr.msk.bf16.mxu0 %vm960_vm0, %v959_v0 }
  0x71   :  { %662 = vmatprep.subr.bf16.mxu0 %v959_v0  ;;  %v763_v17 = vld [vmem:[#allocation7 + $0x30] sm:$0xff]   ;;  %v765_v19 = vld [vmem:[#allocation7 + $0x38] sm:$0xff]   ;;  %v767_v30 = vld [vmem:[#allocation10] sm:$0xff]  }
  0x72   :  { %683 = vmatpush3.bf16.msra.mxu1 %v753_v7  ;;  %v764_v18 = vld [vmem:[#allocation8 + $0x30] sm:$0xff]   ;;  %v766_v20 = vld [vmem:[#allocation8 + $0x38] sm:$0xff]   ;;  %v768_v32 = vld [vmem:[#allocation10 + $0x8] sm:$0xff]  }
  0x73   :  { %118 = vadd.xlane.f32.xlu0 %v117_v6  ;;  %684 = vmatprep.subr.bf16.mxu1 %v959_v0  ;;  %v769_v33 = vld [vmem:[#allocation10 + $0x10] sm:$0xff]   ;;  %v770_v34 = vld [vmem:[#allocation10 + $0x18] sm:$0xff]   ;;  %v771_v35 = vld [vmem:[#allocation10 + $0x20] sm:$0xff]  }
  0x74   :  { %663 = vmatpush3.bf16.msra.mxu0 %v754_v8  ;;  %v772_v36 = vld [vmem:[#allocation10 + $0x28] sm:$0xff]   ;;  %v773_v37 = vld [vmem:[#allocation10 + $0x30] sm:$0xff]   ;;  %v774_v38 = vld [vmem:[#allocation10 + $0x38] sm:$0xff]  }
  0x75   :  { %664 = vmatprep.subr.bf16.mxu0 %v959_v0  ;;  %v775_v39 = vld [vmem:[#allocation11] sm:$0xff]   ;;  %v776_v40 = vld [vmem:[#allocation11 + $0x8] sm:$0xff]   ;;  %v777_v41 = vld [vmem:[#allocation11 + $0x10] sm:$0xff]  }
  0x76   :  { %685 = vmatpush3.bf16.msra.mxu1 %v755_v9  ;;  %v778_v42 = vld [vmem:[#allocation11 + $0x18] sm:$0xff]   ;;  %v779_v43 = vld [vmem:[#allocation11 + $0x20] sm:$0xff]   ;;  %v780_v44 = vld [vmem:[#allocation11 + $0x28] sm:$0xff]  }
  0x77   :  { %686 = vmatprep.subr.bf16.mxu1 %v959_v0  ;;  %v605_v50 = vld [vmem:[%s1171_s4] ss:$0 sm:$0xff]  ;;  %v782_v59 = vld [vmem:[#allocation11 + $0x38] sm:$0xff]  }
  0x78   :  { %665 = vmatpush3.bf16.msra.mxu0 %v756_v10  ;;  %v781_v58 = vld [vmem:[#allocation11 + $0x30] sm:$0xff]  }
  0x79   :  { %666 = vmatprep.subr.bf16.mxu0 %v959_v0  ;;  %v606_v60 = vld [vmem:[%s1173_s6] ss:$0 sm:$0xff]  ;;  %s919_s6 = scalar_lea.vmem %s578_s18, 128 }
  0x7a   :  { %687 = vmatpush3.bf16.msra.mxu1 %v757_v11  ;;  %v615_v5 = vld [vmem:[%s1175_s8] ss:$0 sm:$0xff]  ;;  %p920_p6 = scmp.ne.s32.totalorder %s578_s18, %s919_s6  ;;  %p925_p8 = scmp.lt.s32.totalorder %s919_s6, %s919_s6 }
  0x7b   :  { %688 = vmatprep.subr.bf16.mxu1 %v959_v0 }
  0x7c   :  { %667 = vmatpush3.bf16.msra.mxu0 %v758_v12  ;;  %p926_p9 = por %p925_p8, %p924_p7 }
  0x7d   :  { %668 = vmatprep.subr.bf16.mxu0 %v959_v0 }
  0x7e   :  { %689 = vmatpush3.bf16.msra.mxu1 %v759_v13  ;;  %p927_p10 = pnand %p926_p9, %p920_p6 }
  0x7f   :  { %690 = vmatprep.subr.bf16.mxu1 %v959_v0 }
  0x80   :  { %669 = vmatpush3.bf16.msra.mxu0 %v760_v14 }
  0x81   :  { %670 = vmatprep.subr.bf16.mxu0 %v959_v0 }
  0x82   :  { %691 = vmatpush3.bf16.msra.mxu1 %v761_v15 }
  0x83   :  { %692 = vmatprep.subr.bf16.mxu1 %v959_v0 }
  0x84   :  { %671 = vmatpush3.bf16.msra.mxu0 %v762_v16 }
  0x85   :  { %672 = vmatprep.subr.bf16.mxu0 %v959_v0 }
  0x86   :  { %693 = vmatpush3.bf16.msra.mxu1 %v763_v17 }
  0x87   :  { %694 = vmatprep.subr.bf16.mxu1 %v959_v0 }
  0x88   :  { %673 = vmatpush3.bf16.msra.mxu0 %v764_v18 }
  0x89   :  { %674 = vmatprep.subr.bf16.mxu0 %v959_v0 }
  0x8a   :  { %695 = vmatpush3.bf16.msra.mxu1 %v765_v19 }
  0x8b   :  { %720 = vmatprep.subr.bf16.mxu1 %v959_v0 }
  0x8c   :  { %675 = vmatpush3.bf16.msra.mxu0 %v766_v20 }
  0x8d   :  { %700 = vmatprep.subr.bf16.mxu0 %v959_v0 }
  0xfc   :  { %v116_v21 = vpop.xlane.xlu0 %115 }
  0xfd   :  { %v120_v22 = vmax.f32 %v116_v21, 1e-24 }
  0xff   :  { %783 = vrsqrt.f32 %v120_v22 }
 0x100   :  { %v119_v23 = vpop.xlane.xlu0 %118 }
 0x101   :  { %v124_v24 = vmax.f32 %v119_v23, 1e-24 }
 0x103   :  { %785 = vrsqrt.f32 %v124_v24 }
 0x109   :  { %v784_v25 = vpop.eup %783 }
 0x10a   :  { %v122_v26 = vmul.f32 %v784_v25, %v1098_v1 }
 0x10c   :  { %v123_v27 = vpack.c.bf16 %v122_v26, %v122_v26 }
 0x10d   :  { %v786_v28 = vpop.eup %785 }
 0x10e   :  { %697 = vmatmul.mubr.bf16.vlgmr.msra.gmra.mrb[0].mxu1 %v123_v27  ;;  %v126_v29 = vmul.f32 %v786_v28, %v1100_v2 }
 0x10f   :  { %736 = vmatprep.mubr.msk.bf16.mxu1 %vm960_vm0, %v959_v0  ;;  %721 = vmatpush3.bf16.msra.mxu1 %v775_v39 }
 0x110   :  { %v127_v31 = vpack.c.bf16 %v126_v29, %v126_v29  ;;  %722 = vmatprep.subr.bf16.mxu1 %v959_v0 }
 0x112   :  { %677 = vmatmul.mubr.bf16.vlgmr.msra.gmra.mrb[0].mxu0 %v127_v31 }
 0x113   :  { %701 = vmatpush3.bf16.msra.mxu0 %v767_v30  ;;  %716 = vmatprep.mubr.msk.bf16.mxu0 %vm960_vm0, %v959_v0 }
 0x114   :  { %702 = vmatprep.subr.bf16.mxu0 %v959_v0  ;;  %723 = vmatpush3.bf16.msra.mxu1 %v776_v40 }
 0x115   :  { %724 = vmatprep.subr.bf16.mxu1 %v959_v0 }
 0x117   :  { %703 = vmatpush3.bf16.msra.mxu0 %v768_v32 }
 0x118   :  { %704 = vmatprep.subr.bf16.mxu0 %v959_v0  ;;  %725 = vmatpush3.bf16.msra.mxu1 %v777_v41 }
 0x119   :  { %726 = vmatprep.subr.bf16.mxu1 %v959_v0 }
 0x11b   :  { %705 = vmatpush3.bf16.msra.mxu0 %v769_v33 }
 0x11c   :  { %706 = vmatprep.subr.bf16.mxu0 %v959_v0  ;;  %727 = vmatpush3.bf16.msra.mxu1 %v778_v42 }
 0x11d   :  { %728 = vmatprep.subr.bf16.mxu1 %v959_v0 }
 0x11f   :  { %707 = vmatpush3.bf16.msra.mxu0 %v770_v34 }
 0x120   :  { %708 = vmatprep.subr.bf16.mxu0 %v959_v0  ;;  %729 = vmatpush3.bf16.msra.mxu1 %v779_v43 }
 0x121   :  { %730 = vmatprep.subr.bf16.mxu1 %v959_v0 }
 0x123   :  { %709 = vmatpush3.bf16.msra.mxu0 %v771_v35 }
 0x124   :  { %710 = vmatprep.subr.bf16.mxu0 %v959_v0  ;;  %731 = vmatpush3.bf16.msra.mxu1 %v780_v44 }
 0x125   :  { %732 = vmatprep.subr.bf16.mxu1 %v959_v0 }
 0x127   :  { %711 = vmatpush3.bf16.msra.mxu0 %v772_v36 }
 0x128   :  { %712 = vmatprep.subr.bf16.mxu0 %v959_v0  ;;  %733 = vmatpush3.bf16.msra.mxu1 %v781_v58 }
 0x129   :  { %734 = vmatprep.subr.bf16.mxu1 %v959_v0 }
 0x12b   :  { %713 = vmatpush3.bf16.msra.mxu0 %v773_v37 }
 0x12c   :  { %714 = vmatprep.subr.bf16.mxu0 %v959_v0  ;;  %735 = vmatpush3.bf16.msra.mxu1 %v782_v59 }
 0x12f   :  { %715 = vmatpush3.bf16.msra.mxu0 %v774_v38 }
 0x1e1   :  { %v330_v45 = vpop.f32.mrb[0].mxu1 }
 0x1e2   :  { %v698_v46 = vpop.f32.mrb[1].mxu1 }
 0x1e3   :  { %v333_v47 = vpop.f32.mrb[2].mxu1 }
 0x1e4   :  { %v699_v48 = vpop.f32.mrb[3].mxu1 }
 0x1e5   :  { %v242_v49 = vpop.f32.mrb[0].mxu0 }
 0x1e6   :  { %v331_v51 = vadd.f32 %v330_v45, %v242_v49  ;;  %v678_v52 = vpop.f32.mrb[1].mxu0 }
 0x1e7   :  { %v245_v53 = vpop.f32.mrb[2].mxu0 }
 0x1e8   :  { %v343_v54 = vadd.f32 %v605_v50, %v331_v51  ;;  %v679_v55 = vpop.f32.mrb[3].mxu0 }
 0x1ea   :  { %v344_v56 = vmax.f32 %v343_v54, 0.0 }
 0x1ec   :  { %v345_v57 = vpack.c.bf16 %v344_v56, %v344_v56 }
 0x1ee   :  { %717 = vmatmul.mubr.bf16.vlgmr.msra.gmra.mrb[4].mxu0 %v345_v57 }
 0x2c1   :  { %v451_v61 = vpop.f32.mrb[4].mxu0 }
 0x2c2   :  { %v452_v62 = vadd.f32 %v606_v60, %v451_v61  ;;  %v718_v63 = vpop.f32.mrb[5].mxu0 }
 0x2c3   :  { %v454_v1 = vpop.f32.mrb[6].mxu0 }
 0x2c4   :  { %v457_v2 = vmax.f32 %v452_v62, 0.0  ;;  %v719_v3 = vpop.f32.mrb[7].mxu0 }
 0x2c6   :  { %v458_v4 = vpack.c.bf16 %v457_v2, %v457_v2 }
 0x2c8   :  { %737 = vmatmul.mubr.bf16.vlgmr.msra.gmra.mrb[4].mxu1 %v458_v4 }
 0x39b   :  { %v564_v0 = vpop.f32.mrb[4].mxu1 }
 0x39c   :  { %v565_v6 = vadd.f32 %v615_v5, %v564_v0  ;;  %v738_v7 = vpop.f32.mrb[5].mxu1 }
 0x39d   :  { %v567_v8 = vpop.f32.mrb[6].mxu1 }
 0x39e   :  { %570 = vst [vmem:[#allocation13] sm:$0xff] %v565_v6  ;;  %v739_v9 = vpop.f32.mrb[7].mxu1 }
 0x39f   :  { %930 = shalt.err (!%p927_p10)
}
 0x3a0   :  { %s931_s8 = scalar_lea.hbm %s1176_s9, 128 }
 0x3a1   :  { %p932_p11 = scmp.ne.s32.totalorder %s1176_s9, %s931_s8  ;;  %p935_p12 = scmp.lt.u32.totalorder %s931_s8, %s1176_s9 }
 0x3a3   :  { %p937_p13 = pnand %p935_p12, %p932_p11 }
 0x3a5   :  { %940 = shalt.err (!%p937_p13)
}
 0x3a6   :  { %580 = dma.vmem_to_hbm [thread:$0]  %s578_s18, 128, %s1176_s9, [#allocation4]  }
 0x3a7   :  { %949 = dma.done.wait [#allocation4], 128  }
 0x3a8   :  { %950 = vsyncadd [#allocation4], 4294967168 }
 0x3a9   :  { %584 = vsyncpa [#allocation3], 1 }
 0x3aa   :  { %585 = vsyncpa [#allocation6], 1 }
 0x3ab   :  { %586 = vsyncpa [#allocation9], 1 }
 0x3ac   :  { %587 = vsyncpa [#allocation12], 1 }
 0x3ad   :  { %588 = vsyncpa [#allocation4], 1 }

</bundles_post_ra>
